<compile_context>
chip_gen: v7x
topology: tpu7x:2x2x1
jax: 0.10.0
libtpu: 0.0.40
codegen_flags: <defaults>
</compile_context>

<pallas_src>
import math

import jax
import jax.numpy as jnp
from jax.experimental import pallas as pl
from jax.experimental.pallas import tpu as pltpu


# ---------------------------------------------------------------------------
# Kernel: elementwise add of a VMEM-resident positional-encoding tile.
# ---------------------------------------------------------------------------
def _add_pe_kernel(x_ref, pe_ref, o_ref):
    # x_ref: (Bb, TS, D), pe_ref: (TS, D) -> broadcast add over the batch-block dim.
    o_ref[...] = x_ref[...] + pe_ref[...]


def _build_pe_table(S, D):
    """Sinusoidal table, identical math to the PyTorch module (float32)."""
    assert D % 2 == 0, "d_model must be even (as in the PyTorch module, d_model=768)"
    pos = jnp.arange(S, dtype=jnp.float32)[:, None]                      # (S, 1)
    div_term = jnp.exp(
        jnp.arange(0, D, 2, dtype=jnp.float32) * (-math.log(10000.0) / D)
    )                                                                    # (D/2,)
    angles = pos * div_term                                              # (S, D/2)
    pe = jnp.zeros((S, D), dtype=jnp.float32)
    pe = pe.at[:, 0::2].set(jnp.sin(angles))
    pe = pe.at[:, 1::2].set(jnp.cos(angles))
    return pe


# ---------------------------------------------------------------------------
# Tile selection with an explicit VMEM budget (portable across v5e/v6e/v7x).
# ---------------------------------------------------------------------------
_VMEM_TILE_BUDGET = 24 << 20   # double-buffered block footprint target (bytes)


def _footprint_bytes(bb, ts, D, itemsize):
    x_blk = bb * ts * D * itemsize
    pe_blk = ts * D * itemsize
    # x in + out + pe, each double-buffered by the BlockSpec pipeline.
    return 2 * x_blk + 2 * x_blk + 2 * pe_blk


def _select_tiles(B, S, D, itemsize, budget=_VMEM_TILE_BUDGET):
    # Seq tile: fixed cap (multiple of 32 -> no padded sublane packing for bf16);
    # ragged S handled by a masked partial last tile via cdiv, never a tiny fallback.
    ts_cap = 512 if itemsize >= 4 else 1024
    ts = S if S <= ts_cap else ts_cap
    # Batch block: largest of {8,4,2,1} (clipped to B) that fits the budget.
    bb = 1
    for cand in (8, 4, 2, 1):
        c = max(1, min(B, cand))
        if _footprint_bytes(c, ts, D, itemsize) <= budget:
            bb = c
            break
    # If even Bb=1 is too big (huge S*D), shrink the seq tile (multiples of 32).
    while _footprint_bytes(bb, ts, D, itemsize) > budget and ts > 32:
        ts = max(32, ((ts // 2) // 32) * 32)
    return bb, ts


def positional_encoding(x, *, seq_tile=None, batch_block=None):
    """x: (B, S, D) -> x + sinusoidal positional encoding (matches PyTorch module)."""
    B, S, D = x.shape
    itemsize = jnp.dtype(x.dtype).itemsize
    pe = _build_pe_table(S, D).astype(x.dtype)                           # (S, D)

    bb, ts = _select_tiles(B, S, D, itemsize)
    if seq_tile is not None:
        ts = seq_tile
    if batch_block is not None:
        bb = batch_block
    # Partial seq tiles are fine, but a non-full tile must respect the 8-sublane rule.
    assert ts == S or ts % 8 == 0, "partial seq tile must be a multiple of 8 rows"

    n_s = pl.cdiv(S, ts)
    n_b = pl.cdiv(B, bb)

    fp = _footprint_bytes(bb, ts, D, itemsize)
    # Raise the scoped limit past v5e's 16 MiB default when needed, stay <= v7x's
    # 64 MiB physical VMEM with headroom.
    vmem_limit = int(min(max(2 * fp, 16 << 20), 48 << 20))

    return pl.pallas_call(
        _add_pe_kernel,
        out_shape=jax.ShapeDtypeStruct((B, S, D), x.dtype),
        # Seq tiles outer, batch blocks inner: the pe block index is constant across
        # the inner axis, so each pe tile is DMA'd once per seq tile and stays
        # VMEM-resident while every batch block streams through.  Do NOT flip this
        # order -- it would re-fetch pe every step (extra ~50% traffic at small B).
        grid=(n_s, n_b),
        in_specs=[
            pl.BlockSpec((bb, ts, D), lambda s, b: (b, s, 0)),           # x tile
            pl.BlockSpec((ts, D), lambda s, b: (s, 0)),                  # pe tile (resident)
        ],
        out_specs=pl.BlockSpec((bb, ts, D), lambda s, b: (b, s, 0)),
        # Write the result back into x's HBM buffer (x is consumed by this op in the
        # decoder) -> no extra B*S*D output allocation.
        input_output_aliases={0: 0},
        compiler_params=pltpu.CompilerParams(
            dimension_semantics=("parallel", "parallel"),
            vmem_limit_bytes=vmem_limit,
        ),
    )(x, pe)


# ---------------------------------------------------------------------------
# Pure-JAX reference (mirrors PositionalEncoding.forward).
# ---------------------------------------------------------------------------
def _reference(x):
    B, S, D = x.shape
    pos = jnp.arange(S, dtype=jnp.float32)[:, None]
    div_term = jnp.exp(
        jnp.arange(0, D, 2, dtype=jnp.float32) * (-math.log(10000.0) / D)
    )
    enc = jnp.zeros((S, D), dtype=jnp.float32)
    enc = enc.at[:, 0::2].set(jnp.sin(pos * div_term))
    enc = enc.at[:, 1::2].set(jnp.cos(pos * div_term))
    return x + enc[None, :, :].astype(x.dtype)


if __name__ == "__main__":
    # Test 1: small shapes consistent with the decoder input (batch, seq_len, d_model).
    key = jax.random.PRNGKey(0)
    B, S, D = 2, 8, 32
    x = jax.random.normal(key, (B, S, D), dtype=jnp.float32)
    ref = _reference(x)                     # compute before the (aliasing) kernel call
    out = jax.block_until_ready(positional_encoding(x))
    assert out.shape == (B, S, D)
    assert jnp.allclose(out, ref, atol=1e-5, rtol=1e-5)

    # Test 2: lane-dense feature dim (multiple of 128, like d_model=768), ragged seq
    # and batch so the cdiv-based partial tiles, batch blocking and pe residency
    # (multiple inner batch trips per seq tile) are all exercised.
    B2, S2, D2 = 3, 24, 256
    x2 = jax.random.normal(jax.random.PRNGKey(1), (B2, S2, D2), dtype=jnp.float32)
    ref2 = _reference(x2)
    out2 = jax.block_until_ready(positional_encoding(x2, seq_tile=16, batch_block=2))
    assert jnp.allclose(out2, ref2, atol=1e-5, rtol=1e-5)

    print("KERNEL_OK")
</pallas_src>

<mosaic_0001>
module attributes {stable_mosaic.version = 11 : i64} {
  func.func @_add_pe_kernel(%arg0: i32, %arg1: i32, %arg2: memref<2x8x32xf32, #tpu.memory_space<vmem>>, %arg3: memref<8x32xf32, #tpu.memory_space<vmem>>, %arg4: memref<2x8x32xf32, #tpu.memory_space<vmem>>) attributes {dimension_semantics = [#tpu.dimension_semantics<parallel>, #tpu.dimension_semantics<parallel>], iteration_bounds = array<i64: 1, 1>, scalar_prefetch = 0 : i64, scratch_operands = 0 : i64, tpu.core_type = #tpu.core_type<tc>, window_params = [{transform_indices = @transform_0, window_bounds = array<i64: 2, 8, 32>}, {transform_indices = @transform_1, window_bounds = array<i64: 8, 32>}, {transform_indices = @transform_2, window_bounds = array<i64: 2, 8, 32>}]} {
    %c0 = arith.constant 0 : index
    %c0_0 = arith.constant 0 : index
    %c0_1 = arith.constant 0 : index
    %0 = vector.load %arg2[%c0, %c0_0, %c0_1] : memref<2x8x32xf32, #tpu.memory_space<vmem>>, vector<2x8x32xf32>
    %c0_2 = arith.constant 0 : index
    %c0_3 = arith.constant 0 : index
    %1 = vector.load %arg3[%c0_2, %c0_3] : memref<8x32xf32, #tpu.memory_space<vmem>>, vector<8x32xf32>
    %2 = vector.shape_cast %1 : vector<8x32xf32> to vector<1x8x32xf32>
    %3 = vector.broadcast %2 : vector<1x8x32xf32> to vector<2x8x32xf32>
    %4 = arith.addf %0, %3 : vector<2x8x32xf32>
    %c0_4 = arith.constant 0 : index
    %c0_5 = arith.constant 0 : index
    %c0_6 = arith.constant 0 : index
    %5 = vector.load %arg4[%c0_4, %c0_5, %c0_6] : memref<2x8x32xf32, #tpu.memory_space<vmem>>, vector<2x8x32xf32>
    tpu.vector_store %arg4[%c0_4, %c0_5, %c0_6], %4 {strides = array<i32>} : memref<2x8x32xf32, #tpu.memory_space<vmem>>, vector<2x8x32xf32>,
    return
  }
  func.func @transform_0(%arg0: i32, %arg1: i32) -> (i32, i32, i32) {
    %c0_i32 = arith.constant 0 : i32
    %c0_i32_0 = arith.constant 0 : i32
    return %arg1, %arg0, %c0_i32 : i32, i32, i32
  }
  func.func @transform_1(%arg0: i32, %arg1: i32) -> (i32, i32) {
    %c0_i32 = arith.constant 0 : i32
    %c0_i32_0 = arith.constant 0 : i32
    return %arg0, %c0_i32 : i32, i32
  }
  func.func @transform_2(%arg0: i32, %arg1: i32) -> (i32, i32, i32) {
    %c0_i32 = arith.constant 0 : i32
    %c0_i32_0 = arith.constant 0 : i32
    return %arg1, %arg0, %c0_i32 : i32, i32, i32
  }
}

</mosaic_0001>

<bundles_post_ra>
// kernel: tpu_custom_call.1
= control target key start
LH: loop header
LB: loop body
LE: loop exit
PB: predicated region body
PF: predicated region fallthrough
CT: control target
= control target key end

     0   :  { %7 = vsyncpa [#allocation3], 0  ;;  %s155_s0 = inlined_call_operand.hbm [shape: f32[2,8,32], index: 0, kind: input, shape index: {}, may-alias: {0,2}]   ;;  %s156_s1 = inlined_call_operand.vmem [shape: f32[8,32], index: 1, kind: input, shape index: {}]   ;;  %s157_s2 = inlined_call_operand.hbm [shape: f32[2,8,32], index: 2, kind: output, shape index: {}, may-alias: {0,2}]  }
   0x1   :  { %8 = vsyncpa [#allocation4], 0  ;;  %s103_s9 = smov [#allocation2]   ;;  %s55_s13 = scalar_lea.hbm %s155_s0, 256 }
   0x2   :  { %s14_s10 = sshll.u32 %s103_s9, 4  ;;  %p56_p0 = scmp.ne.s32.totalorder %s155_s0, %s55_s13  ;;  %s15_s10 = int_to_ptr.vmem [resolvable:$true] %s14_s10 }
   0x3   :  { %p59_p1 = scmp.lt.u32.totalorder %s55_s13, %s155_s0 }
   0x5   :  { %p61_p2 = pnand %p59_p1, %p56_p0 }
   0x7   :  { %64 = shalt.err (!%p61_p2)
}
   0x8   :  { %s65_s18 = scalar_lea.vmem %s15_s10, 256  ;;  %p70_p4 = scmp.lt.s32.totalorder %s15_s10, %s15_s10 }
   0x9   :  { %p66_p3 = scmp.ne.s32.totalorder %s15_s10, %s65_s18  ;;  %p71_p5 = scmp.lt.s32.totalorder %s65_s18, %s65_s18 }
   0xb   :  { %p72_p6 = por %p71_p5, %p70_p4 }
   0xd   :  { %p73_p7 = pnand %p72_p6, %p66_p3 }
   0xf   :  { %76 = shalt.err (!%p73_p7)
}
  0x10   :  { %s104_s19 = smov 128   ;;  %s105_s20 = smov 8  }
  0x11   :  { %20 = dma.hbm_to_vmem [thread:$0]  %s155_s0, 256, %s15_s10, [#allocation3], %s104_s19, %s104_s19, %s105_s20  }
  0x12   :  { %99 = dma.done.wait [#allocation3], 256  }
  0x13   :  { %100 = vsyncadd [#allocation3], 4294967040  ;;  %s106_s23 = smov [#allocation5]   ;;  %v26_v0 = vld [vmem:[#allocation2] sm:$0xff]  ;;  %vm31_vm0 = vcmask 261120   ;;  %v27_v2 = vld [vmem:[#allocation2 + $0x8] sm:$0xff] }
  0x14   :  { %s39_s24 = sshll.u32 %s106_s23, 4  ;;  %v28_v1 = vld [vmem:[%s156_s1] sm:$0xff]  ;;  %s40_s24 = int_to_ptr.vmem [resolvable:$true] %s39_s24 }
  0x15   :  { %v29_v3 = vadd.f32 %v28_v1, %v26_v0  ;;  %v30_v4 = vadd.f32 %v28_v1, %v27_v2  ;;  %s77_s27 = scalar_lea.vmem %s40_s24, 256  ;;  %p82_p9 = scmp.lt.s32.totalorder %s40_s24, %s40_s24 }
  0x16   :  { %p78_p8 = scmp.ne.s32.totalorder %s40_s24, %s77_s27  ;;  %p83_p10 = scmp.lt.s32.totalorder %s77_s27, %s77_s27 }
  0x17   :  { %32 = vst.msk [vmem:[#allocation5] sm:$0xff] %vm31_vm0, %v29_v3  ;;  %33 = vst.msk [vmem:[#allocation5 + $0x8] sm:$0xff] %vm31_vm0, %v30_v4 }
  0x18   :  { %p84_p11 = por %p83_p10, %p82_p9 }
  0x1a   :  { %p85_p12 = pnand %p84_p11, %p78_p8 }
  0x1c   :  { %88 = shalt.err (!%p85_p12)
}
  0x1d   :  { %s89_s29 = scalar_lea.hbm %s157_s2, 256 }
  0x1e   :  { %p90_p13 = scmp.ne.s32.totalorder %s157_s2, %s89_s29  ;;  %p93_p0 = scmp.lt.u32.totalorder %s89_s29, %s157_s2 }
  0x20   :  { %p95_p1 = pnand %p93_p0, %p90_p13 }
  0x22   :  { %98 = shalt.err (!%p95_p1)
}
  0x23   :  { %45 = dma.vmem_to_hbm [thread:$0]  %s40_s24, 256, %s157_s2, [#allocation4], %s104_s19, %s104_s19, %s105_s20  }
  0x24   :  { %101 = dma.done.wait [#allocation4], 256  }
  0x25   :  { %102 = vsyncadd [#allocation4], 4294967040 }
  0x26   :  { %49 = vsyncpa [#allocation3], 1 }
  0x27   :  { %50 = vsyncpa [#allocation4], 1 }

</bundles_post_ra>
